<compile_context>
chip_gen: v6e
topology: v6e:2x2x1
jax: 0.10.0
libtpu: 0.0.40
codegen_flags: <defaults>
</compile_context>

<pallas_src>
import jax
import jax.numpy as jnp
from jax.experimental import pallas as pl
from jax.experimental.pallas import tpu as pltpu


# ---------------------------------------------------------------------------
# Kernel
# ---------------------------------------------------------------------------
def track_linear1_kernel(x_ref, wa_ref, w2_ref, w3_ref, w4_ref, b_ref, out_ref):
    """Fused forward for one batch tile.

    x_ref  : (BT, Fin)      matmul dtype (bf16)
    wa_ref : (Fin, n1)      folded branch+head-layer-1 weight
    w2_ref : (n1, n2)       head layer 2 weight
    w3_ref : (n2, n3)       head layer 3 weight
    w4_ref : (n3, n4)       head layer 4 weight
    b_ref  : (4, n_max) f32 packed biases (row k = bias of layer k, zero pad)
    out_ref: (BT, n4)  f32
    """
    n1 = wa_ref.shape[1]
    n2 = w2_ref.shape[1]
    n3 = w3_ref.shape[1]
    n4 = w4_ref.shape[1]

    # Layer 1 (folded branches + first head linear) + ReLU
    y = jnp.dot(x_ref[...], wa_ref[...], preferred_element_type=jnp.float32)
    y = jnp.maximum(y + b_ref[0:1, 0:n1], 0.0)

    # Head layer 2 + ReLU
    y = jnp.dot(y.astype(w2_ref.dtype), w2_ref[...],
                preferred_element_type=jnp.float32)
    y = jnp.maximum(y + b_ref[1:2, 0:n2], 0.0)

    # Head layer 3 + ReLU
    y = jnp.dot(y.astype(w3_ref.dtype), w3_ref[...],
                preferred_element_type=jnp.float32)
    y = jnp.maximum(y + b_ref[2:3, 0:n3], 0.0)

    # Head layer 4 (no activation).  Output lane width is 1 (masked stores),
    # acceptable since total output bytes are tiny.
    y = jnp.dot(y.astype(w4_ref.dtype), w4_ref[...],
                preferred_element_type=jnp.float32)
    out_ref[...] = (y + b_ref[3:4, 0:n4]).astype(out_ref.dtype)


# ---------------------------------------------------------------------------
# Parameter construction (shapes identical to Track_Linear1.__init__)
# Weights stored as (in_features, out_features); biases as (1, out_features).
# ---------------------------------------------------------------------------
def make_params(key, mt0, mt1, mt2, lin_h_o):
    lin_h = lin_h_o * 2
    lin2_h = lin_h_o * 3 * 2
    layer_dims = [
        # branch 0
        (mt0, lin_h), (lin_h, lin_h + 1), (lin_h + 1, lin_h_o),
        # branch 1
        (mt1, lin_h), (lin_h, lin_h + 1), (lin_h + 1, lin_h_o),
        # branch 2
        (mt2, lin_h), (lin_h, lin_h + 1), (lin_h + 1, lin_h_o),
        # head
        (lin_h_o * 3, lin2_h), (lin2_h, lin2_h // 2 + 1),
        (lin2_h // 2 + 1, lin_h_o), (lin_h_o, 1),
    ]
    params = []
    for i, (fin, fout) in enumerate(layer_dims):
        kw, kb = jax.random.split(jax.random.fold_in(key, i))
        bound = 1.0 / (fin ** 0.5)
        w = jax.random.uniform(kw, (fin, fout), jnp.float32, -bound, bound)
        b = jax.random.uniform(kb, (1, fout), jnp.float32, -bound, bound)
        params.append((w, b))
    return params


# ---------------------------------------------------------------------------
# Algebraic folding of all activation-free linears into one affine map.
#   concat(h0,h1,h2) @ Wl + bl  ==  concat(x0,x1,x2) @ A + c
# ---------------------------------------------------------------------------
def fold_params(params, lin_h_o):
    (w1a0, b1a0), (w2a0, b2a0), (w3a0, b3a0), \
    (w1a1, b1a1), (w2a1, b2a1), (w3a1, b3a1), \
    (w1a2, b1a2), (w2a2, b2a2), (w3a2, b3a2), \
    (wl, bl), (wh2, bh2), (wh3, bh3), (wh4, bh4) = params

    def fold_branch(w1, b1, w2, b2, w3, b3, wl_blk):
        m = w1 @ w2 @ w3 @ wl_blk                       # (mt_i, lin2_h)
        v = ((b1 @ w2 + b2) @ w3 + b3) @ wl_blk         # (1, lin2_h)
        return m, v

    wl0 = wl[0 * lin_h_o:1 * lin_h_o]
    wl1 = wl[1 * lin_h_o:2 * lin_h_o]
    wl2 = wl[2 * lin_h_o:3 * lin_h_o]
    m0, v0 = fold_branch(w1a0, b1a0, w2a0, b2a0, w3a0, b3a0, wl0)
    m1, v1 = fold_branch(w1a1, b1a1, w2a1, b2a1, w3a1, b3a1, wl1)
    m2, v2 = fold_branch(w1a2, b1a2, w2a2, b2a2, w3a2, b3a2, wl2)

    A = jnp.concatenate([m0, m1, m2], axis=0)           # (mt0+mt1+mt2, lin2_h)
    c = v0 + v1 + v2 + bl                               # (1, lin2_h)
    return A, c, wh2, bh2, wh3, bh3, wh4, bh4


# ---------------------------------------------------------------------------
# Wrapper
# ---------------------------------------------------------------------------
def track_linear1_forward(x0, x1, x2, params, lin_h_o, *,
                          block_batch=512, matmul_dtype=jnp.bfloat16):
    A, c, w2, b2, w3, b3, w4, b4 = fold_params(params, lin_h_o)

    n1, n2, n3, n4 = A.shape[1], w2.shape[1], w3.shape[1], w4.shape[1]
    n_max = max(n1, n2, n3, n4)

    # Pack the 4 biases (f32) into one small array: one DMA instead of four.
    bias_pack = jnp.zeros((4, n_max), jnp.float32)
    bias_pack = bias_pack.at[0, :n1].set(c[0])
    bias_pack = bias_pack.at[1, :n2].set(b2[0])
    bias_pack = bias_pack.at[2, :n3].set(b3[0])
    bias_pack = bias_pack.at[3, :n4].set(b4[0])

    # Single concatenated input (one DMA per tile instead of three).
    x = jnp.concatenate([x0, x1, x2], axis=1)
    B, fin = x.shape

    # Batch tiling: pad batch to a multiple of the tile (and of 8 sublanes).
    bp = ((max(B, 8) + 7) // 8) * 8
    bt = min(block_batch, bp)          # block_batch must be a multiple of 8
    bp = ((bp + bt - 1) // bt) * bt
    if bp != B:
        x = jnp.pad(x, ((0, bp - B), (0, 0)))

    # bf16 operands for the MXU; f32 accumulation + f32 elementwise in-kernel.
    x_m = x.astype(matmul_dtype)
    A_m, w2_m, w3_m, w4_m = (w.astype(matmul_dtype) for w in (A, w2, w3, w4))

    grid = (bp // bt,)

    flops = 2 * bp * (fin * n1 + n1 * n2 + n2 * n3 + n3 * n4)
    bytes_accessed = (
        x_m.size * x_m.dtype.itemsize
        + sum(w.size * w.dtype.itemsize for w in (A_m, w2_m, w3_m, w4_m))
        + bias_pack.size * bias_pack.dtype.itemsize
        + bp * n4 * 4)

    def _weight_spec(w):
        # Whole array, constant index_map -> stays VMEM-resident across steps.
        return pl.BlockSpec(w.shape, lambda i: (0, 0))

    out = pl.pallas_call(
        track_linear1_kernel,
        out_shape=jax.ShapeDtypeStruct((bp, n4), jnp.float32),
        grid=grid,
        in_specs=[
            pl.BlockSpec((bt, fin), lambda i: (i, 0)),   # x tile (pipelined)
            _weight_spec(A_m),
            _weight_spec(w2_m),
            _weight_spec(w3_m),
            _weight_spec(w4_m),
            _weight_spec(bias_pack),
        ],
        out_specs=pl.BlockSpec((bt, n4), lambda i: (i, 0)),
        compiler_params=pltpu.CompilerParams(
            dimension_semantics=("parallel",)),          # both TCs on v7x
        cost_estimate=pl.CostEstimate(
            flops=flops, transcendentals=0, bytes_accessed=bytes_accessed),
    )(x_m, A_m, w2_m, w3_m, w4_m, bias_pack)

    return out[:B]


# ---------------------------------------------------------------------------
# Pure-JAX f32 reference mirroring the PyTorch forward (unfolded).
# ---------------------------------------------------------------------------
def reference_forward(x0, x1, x2, params, lin_h_o):
    def lin(x, wb):
        w, b = wb
        return x @ w + b
    p = params
    h0 = lin(lin(lin(x0, p[0]), p[1]), p[2])
    h1 = lin(lin(lin(x1, p[3]), p[4]), p[5])
    h2 = lin(lin(lin(x2, p[6]), p[7]), p[8])
    h = jnp.concatenate([h0, h1, h2], axis=1)
    y = jax.nn.relu(lin(h, p[9]))
    y = jax.nn.relu(lin(y, p[10]))
    y = jax.nn.relu(lin(y, p[11]))
    return lin(y, p[12])


if __name__ == "__main__":
    # Small shapes consistent with the module: mt0 = mt1 = mt2 = M.
    B = 20          # deliberately not a multiple of 8 to exercise padding
    M = 16
    LIN_H_O = 8

    key = jax.random.PRNGKey(0)
    kx0, kx1, kx2, kp = jax.random.split(key, 4)
    x0 = jax.random.normal(kx0, (B, M), jnp.float32)
    x1 = jax.random.normal(kx1, (B, M), jnp.float32)
    x2 = jax.random.normal(kx2, (B, M), jnp.float32)

    params = make_params(kp, M, M, M, LIN_H_O)

    # Small block_batch here so the demo exercises a multi-step grid
    # (production batches would use the default block_batch=512).
    out = track_linear1_forward(x0, x1, x2, params, LIN_H_O, block_batch=8)
    out = jax.block_until_ready(out)

    ref = reference_forward(x0, x1, x2, params, LIN_H_O)
    assert out.shape == (B, 1), out.shape
    # Loosened tolerance: weight folding reorders f32 sums and matmul operands
    # are bf16 (MXU-native); accumulation is f32.
    assert jnp.allclose(out, ref, atol=2e-2, rtol=2e-2), (out, ref)

    print("KERNEL_OK")
</pallas_src>

<mosaic_0001>
module attributes {stable_mosaic.version = 11 : i64} {
  func.func @track_linear1_kernel(%arg0: i32, %arg1: memref<8x48xbf16, #tpu.memory_space<vmem>>, %arg2: memref<48x48xbf16, #tpu.memory_space<vmem>>, %arg3: memref<48x25xbf16, #tpu.memory_space<vmem>>, %arg4: memref<25x8xbf16, #tpu.memory_space<vmem>>, %arg5: memref<8x1xbf16, #tpu.memory_space<vmem>>, %arg6: memref<4x48xf32, #tpu.memory_space<vmem>>, %arg7: memref<8x1xf32, #tpu.memory_space<vmem>>) attributes {dimension_semantics = [#tpu.dimension_semantics<parallel>], iteration_bounds = array<i64: 3>, scalar_prefetch = 0 : i64, scratch_operands = 0 : i64, tpu.core_type = #tpu.core_type<tc>, window_params = [{transform_indices = @transform_0, window_bounds = array<i64: 8, 48>}, {pipeline_mode = #tpu.pipeline_mode<synchronous>, transform_indices = @transform_1, window_bounds = array<i64: 48, 48>}, {pipeline_mode = #tpu.pipeline_mode<synchronous>, transform_indices = @transform_2, window_bounds = array<i64: 48, 25>}, {pipeline_mode = #tpu.pipeline_mode<synchronous>, transform_indices = @transform_3, window_bounds = array<i64: 25, 8>}, {pipeline_mode = #tpu.pipeline_mode<synchronous>, transform_indices = @transform_4, window_bounds = array<i64: 8, 1>}, {pipeline_mode = #tpu.pipeline_mode<synchronous>, transform_indices = @transform_5, window_bounds = array<i64: 4, 48>}, {transform_indices = @transform_6, window_bounds = array<i64: 8, 1>}]} {
    %c0 = arith.constant 0 : index
    %c0_0 = arith.constant 0 : index
    %0 = vector.load %arg1[%c0, %c0_0] : memref<8x48xbf16, #tpu.memory_space<vmem>>, vector<8x48xbf16>
    %c0_1 = arith.constant 0 : index
    %c0_2 = arith.constant 0 : index
    %1 = vector.load %arg2[%c0_1, %c0_2] : memref<48x48xbf16, #tpu.memory_space<vmem>>, vector<48x48xbf16>
    %cst = arith.constant dense<0.000000e+00> : vector<8x48xf32>
    %2 = tpu.matmul %0, %1, %cst {dimension_numbers = #tpu.dot_dimension_numbers<[1], [0], [0], [1], [0, 0, 1, 1], [], []>} : vector<8x48xbf16>, vector<48x48xbf16>, vector<8x48xf32> -> vector<8x48xf32>
    %c0_3 = arith.constant 0 : index
    %c0_4 = arith.constant 0 : index
    %3 = vector.load %arg6[%c0_3, %c0_4] : memref<4x48xf32, #tpu.memory_space<vmem>>, vector<1x48xf32>
    %4 = vector.broadcast %3 : vector<1x48xf32> to vector<8x48xf32>
    %5 = arith.addf %2, %4 : vector<8x48xf32>
    %cst_5 = arith.constant 0.000000e+00 : f32
    %6 = vector.broadcast %cst_5 : f32 to vector<8x48xf32>
    %7 = arith.maximumf %5, %6 : vector<8x48xf32>
    %8 = arith.truncf %7 : vector<8x48xf32> to vector<8x48xbf16>
    %c0_6 = arith.constant 0 : index
    %c0_7 = arith.constant 0 : index
    %9 = vector.load %arg3[%c0_6, %c0_7] : memref<48x25xbf16, #tpu.memory_space<vmem>>, vector<48x25xbf16>
    %cst_8 = arith.constant dense<0.000000e+00> : vector<8x25xf32>
    %10 = tpu.matmul %8, %9, %cst_8 {dimension_numbers = #tpu.dot_dimension_numbers<[1], [0], [0], [1], [0, 0, 1, 1], [], []>} : vector<8x48xbf16>, vector<48x25xbf16>, vector<8x25xf32> -> vector<8x25xf32>
    %c1 = arith.constant 1 : index
    %c0_9 = arith.constant 0 : index
    %11 = vector.load %arg6[%c1, %c0_9] : memref<4x48xf32, #tpu.memory_space<vmem>>, vector<1x25xf32>
    %12 = vector.broadcast %11 : vector<1x25xf32> to vector<8x25xf32>
    %13 = arith.addf %10, %12 : vector<8x25xf32>
    %cst_10 = arith.constant 0.000000e+00 : f32
    %14 = vector.broadcast %cst_10 : f32 to vector<8x25xf32>
    %15 = arith.maximumf %13, %14 : vector<8x25xf32>
    %16 = arith.truncf %15 : vector<8x25xf32> to vector<8x25xbf16>
    %c0_11 = arith.constant 0 : index
    %c0_12 = arith.constant 0 : index
    %17 = vector.load %arg4[%c0_11, %c0_12] : memref<25x8xbf16, #tpu.memory_space<vmem>>, vector<25x8xbf16>
    %cst_13 = arith.constant dense<0.000000e+00> : vector<8x8xf32>
    %18 = tpu.matmul %16, %17, %cst_13 {dimension_numbers = #tpu.dot_dimension_numbers<[1], [0], [0], [1], [0, 0, 1, 1], [], []>} : vector<8x25xbf16>, vector<25x8xbf16>, vector<8x8xf32> -> vector<8x8xf32>
    %c2 = arith.constant 2 : index
    %c0_14 = arith.constant 0 : index
    %19 = vector.load %arg6[%c2, %c0_14] : memref<4x48xf32, #tpu.memory_space<vmem>>, vector<1x8xf32>
    %20 = vector.broadcast %19 : vector<1x8xf32> to vector<8x8xf32>
    %21 = arith.addf %18, %20 : vector<8x8xf32>
    %cst_15 = arith.constant 0.000000e+00 : f32
    %22 = vector.broadcast %cst_15 : f32 to vector<8x8xf32>
    %23 = arith.maximumf %21, %22 : vector<8x8xf32>
    %24 = arith.truncf %23 : vector<8x8xf32> to vector<8x8xbf16>
    %c0_16 = arith.constant 0 : index
    %c0_17 = arith.constant 0 : index
    %25 = vector.load %arg5[%c0_16, %c0_17] : memref<8x1xbf16, #tpu.memory_space<vmem>>, vector<8x1xbf16>
    %cst_18 = arith.constant dense<0.000000e+00> : vector<8x1xf32>
    %26 = tpu.matmul %24, %25, %cst_18 {dimension_numbers = #tpu.dot_dimension_numbers<[1], [0], [0], [1], [0, 0, 1, 1], [], []>} : vector<8x8xbf16>, vector<8x1xbf16>, vector<8x1xf32> -> vector<8x1xf32>
    %c3 = arith.constant 3 : index
    %c0_19 = arith.constant 0 : index
    %27 = vector.load %arg6[%c3, %c0_19] : memref<4x48xf32, #tpu.memory_space<vmem>>, vector<1x1xf32>
    %28 = vector.broadcast %27 : vector<1x1xf32> to vector<8x1xf32>
    %29 = arith.addf %26, %28 : vector<8x1xf32>
    %c0_20 = arith.constant 0 : index
    %c0_21 = arith.constant 0 : index
    %30 = vector.load %arg7[%c0_20, %c0_21] : memref<8x1xf32, #tpu.memory_space<vmem>>, vector<8x1xf32>
    tpu.vector_store %arg7[%c0_20, %c0_21], %29 {strides = array<i32>} : memref<8x1xf32, #tpu.memory_space<vmem>>, vector<8x1xf32>,
    return
  }
  func.func @transform_0(%arg0: i32) -> (i32, i32) {
    %c0_i32 = arith.constant 0 : i32
    %c0_i32_0 = arith.constant 0 : i32
    return %arg0, %c0_i32 : i32, i32
  }
  func.func @transform_1(%arg0: i32) -> (i32, i32) {
    %c0_i32 = arith.constant 0 : i32
    %c0_i32_0 = arith.constant 0 : i32
    %c0_i32_1 = arith.constant 0 : i32
    return %c0_i32, %c0_i32_0 : i32, i32
  }
  func.func @transform_2(%arg0: i32) -> (i32, i32) {
    %c0_i32 = arith.constant 0 : i32
    %c0_i32_0 = arith.constant 0 : i32
    %c0_i32_1 = arith.constant 0 : i32
    return %c0_i32, %c0_i32_0 : i32, i32
  }
  func.func @transform_3(%arg0: i32) -> (i32, i32) {
    %c0_i32 = arith.constant 0 : i32
    %c0_i32_0 = arith.constant 0 : i32
    %c0_i32_1 = arith.constant 0 : i32
    return %c0_i32, %c0_i32_0 : i32, i32
  }
  func.func @transform_4(%arg0: i32) -> (i32, i32) {
    %c0_i32 = arith.constant 0 : i32
    %c0_i32_0 = arith.constant 0 : i32
    %c0_i32_1 = arith.constant 0 : i32
    return %c0_i32, %c0_i32_0 : i32, i32
  }
  func.func @transform_5(%arg0: i32) -> (i32, i32) {
    %c0_i32 = arith.constant 0 : i32
    %c0_i32_0 = arith.constant 0 : i32
    %c0_i32_1 = arith.constant 0 : i32
    return %c0_i32, %c0_i32_0 : i32, i32
  }
  func.func @transform_6(%arg0: i32) -> (i32, i32) {
    %c0_i32 = arith.constant 0 : i32
    %c0_i32_0 = arith.constant 0 : i32
    return %arg0, %c0_i32 : i32, i32
  }
}

</mosaic_0001>

<bundles_post_ra>
// kernel: tpu_custom_call.1
= control target key start
LH: loop header
LB: loop body
LE: loop exit
PB: predicated region body
PF: predicated region fallthrough
CT: control target
= control target key end

     0   :  { %s716_s21 = smov 0   ;;  %s784_s0 = inlined_call_operand.vmem [shape: bf16[24,48], index: 0, kind: input, shape index: {}]   ;;  %s785_s1 = inlined_call_operand.vmem [shape: bf16[48,48], index: 1, kind: input, shape index: {}]   ;;  %s786_s2 = inlined_call_operand.vmem [shape: bf16[48,25], index: 2, kind: input, shape index: {}]   ;;  %s787_s3 = inlined_call_operand.vmem [shape: bf16[25,8], index: 3, kind: input, shape index: {}]   ;;  %s788_s4 = inlined_call_operand.vmem [shape: bf16[8,1], index: 4, kind: input, shape index: {}]   ;;  %s789_s5 = inlined_call_operand.vmem [shape: f32[4,48], index: 5, kind: input, shape index: {}]   ;;  %s790_s6 = inlined_call_operand.vmem [shape: f32[24,1], index: 6, kind: output, shape index: {}]  }
   0x1 LB: > { %s579_s22 = sadd.s32 4294967295, %s676_s21   ;;  %p583_p0 = scmp.ge.s32.totalorder %s676_s21, 1  ;;  %s676_s21 = sphi %s716_s21, %s16_s21  }
   0x2   : > { %p211_p1 = scmp.lt.s32.totalorder %s676_s21, 4 }
   0x4   : > { %p212_p2 = pnand %p583_p0, %p211_p1 }
   0x5   : > { %p239_p3 = scmp.lt.s32.totalorder (!%p212_p2), %s579_s22, 2 }
   0x6   : > { %215 = sbr.rel (%p212_p2) target bundleno = 820 (0x334), region = 44 }
   0xb   : > { %v662_v0 = vld [vmem:[%s785_s1 + $0x10] sm:$0xff]   ;;  %v678_v1 = vmov 0.0   ;;  %v663_v2 = vld [vmem:[%s785_s1 + $0x8] sm:$0xff]   ;;  %vm679_vm0 = vmmov 0   ;;  %s792_s22 = smov (!%p239_p3, %s579_s22), 2  ;;  %v664_v4 = vld [vmem:[%s785_s1] sm:$0xff]  }
   0xc   : > { %617 = vmatprep.subr.bf16.mxu0 %v678_v1  ;;  %627 = vmatprep.subr.bf16.mxu1 %v678_v1  ;;  %v665_v3 = vld [vmem:[%s786_s2 + $0x10] sm:$0xff]   ;;  %s584_s7 = sshll.u32 %s792_s22, 2  ;;  %vm278_vm1 = vcmask 392192   ;;  %v666_v6 = vld [vmem:[%s786_s2 + $0x8] sm:$0xff]   ;;  %v667_v7 = vld [vmem:[%s786_s2] sm:$0xff]   ;;  %vm422_vm2 = vcmask 1043456  }
   0xd   : > { %618 = vmatpush3.bf16.msra.mxu0 %v662_v0  ;;  %623 = vmatprep.mubr.msk.bf16.mxu0 %vm679_vm0, %v678_v1  ;;  %s242_s10 = scalar_lea.vmem %s784_s0, %s584_s7  ;;  %v668_v8 = vld [vmem:[%s787_s3 + $0x8] sm:$0x1f]   ;;  %vm423_vm3 = vcmask 1044480   ;;  %v680_v9 = vmov 65535   ;;  %v586_v13 = vld [vmem:[%s789_s5] ss:$0 sm:$0xff] }
   0xe   : > { %619 = vmatprep.subr.bf16.mxu0 %v678_v1  ;;  %633 = vmatprep.mubr.msk.bf16.mxu1 %vm679_vm0, %v678_v1  ;;  %v248_v5 = vld [vmem:[%s242_s10] sm:$0xf]  ;;  %v424_v10 = vsel %vm422_vm2, 4294967295, %v680_v9  ;;  %vm418_vm4 = vcmask 203776   ;;  %vm477_vm5 = vcmask 64512   ;;  %s585_s29 = sshll.u32 %s792_s22, 3 }
   0xf   : > { %628 = vmatpush3.bf16.msra.mxu1 %v665_v3  ;;  %v425_v11 = vsel %vm423_vm3, %v424_v10, 0  ;;  %v669_v21 = vld [vmem:[%s787_s3] sm:$0xff]   ;;  %s246_s10 = scalar_lea.vmem %s790_s6, %s585_s29  ;;  %vm524_vm6 = vcmask 7168  }
  0x10   : > { %629 = vmatprep.subr.bf16.mxu1 %v678_v1  ;;  %v427_v12 = vand.u32 %v668_v8, %v425_v11  ;;  %v471_v22 = vld [vmem:[%s788_s4] sm:$0xf] }
  0x11   : > { %620 = vmatpush3.bf16.msra.mxu0 %v663_v2  ;;  %v482_v23 = vsel %vm422_vm2, %v471_v22, 0  ;;  %v591_v24 = vld [vmem:[%s789_s5 + $0x1] ss:$0 sm:$0xff]  ;;  %v596_v32 = vld [vmem:[%s789_s5 + $0x2] ss:$0 sm:$0xff] }
  0x12   : > { %621 = vmatprep.subr.bf16.mxu0 %v678_v1  ;;  %v600_v40 = vld [vmem:[%s789_s5 + $0x3] ss:$0 sm:$0xff] }
  0x13   : > { %630 = vmatpush3.bf16.msra.mxu1 %v666_v6 }
  0x14   : > { %631 = vmatprep.subr.bf16.mxu1 %v678_v1 }
  0x15   : > { %622 = vmatpush3.bf16.msra.mxu0 %v664_v4 }
  0x16   : > { %637 = vmatprep.subr.bf16.mxu0 %v678_v1 }
  0x17   : > { %632 = vmatpush3.bf16.msra.mxu1 %v667_v7 }
  0x18   : > { %624 = vmatmul.mubr.msk.bf16.vlgmr.msra.gmra.mxu0 %vm278_vm1, %v248_v5  ;;  %645 = vmatprep.subr.bf16.mxu1 %v678_v1 }
  0x19   : > { %641 = vmatprep.mubr.msk.bf16.mxu0 %vm679_vm0, %v678_v1  ;;  %638 = vmatpush3.bf16.msra.mxu0 %v427_v12 }
  0x1a   : > { %639 = vmatprep.subr.bf16.mxu0 %v678_v1 }
  0x1d   : > { %640 = vmatpush3.bf16.msra.mxu0 %v669_v21 }
  0xd8   : > { %v316_v14 = vpop.f32.mrf.mxu0 }
  0xd9   : > { %v317_v15 = vadd.f32 %v586_v13, %v316_v14 }
  0xda   : > { %v625_v16 = vpop.f32.mrf.mxu0 }
  0xdb   : > { %v322_v17 = vmax.f32 %v317_v15, 0.0 }
  0xdc   : > { %v319_v18 = vpop.f32.mrf.mxu0 }
  0xdd   : > { %v323_v19 = vpack.c.bf16 %v322_v17, %v322_v17 }
  0xde   : > { %v626_v20 = vpop.f32.mrf.mxu0 }
  0xdf   : > { %634 = vmatmul.mubr.msk.bf16.vlgmr.msra.gmra.mxu1 %vm278_vm1, %v323_v19 }
  0xe0   : > { %647 = vmatprep.mubr.msk.bf16.mxu1 %vm679_vm0, %v678_v1  ;;  %646 = vmatpush3.bf16.msra.mxu1 %v482_v23 }
 0x19f   : > { %v390_v25 = vpop.f32.mrf.mxu1 }
 0x1a0   : > { %v391_v26 = vadd.f32 %v591_v24, %v390_v25 }
 0x1a1   : > { %v635_v27 = vpop.f32.mrf.mxu1 }
 0x1a2   : > { %v396_v28 = vmax.f32 %v391_v26, 0.0 }
 0x1a3   : > { %v393_v29 = vpop.f32.mrf.mxu1 }
 0x1a4   : > { %v397_v30 = vpack.c.bf16 %v396_v28, %v396_v28 }
 0x1a5   : > { %v636_v31 = vpop.f32.mrf.mxu1 }
 0x1a6   : > { %642 = vmatmul.mubr.msk.bf16.vlgmr.msra.gmra.mxu0 %vm418_vm4, %v397_v30 }
 0x266   : > { %v463_v33 = vpop.f32.mrf.mxu0 }
 0x267   : > { %v464_v34 = vadd.f32 %v596_v32, %v463_v33 }
 0x268   : > { %v643_v35 = vpop.f32.mrf.mxu0 }
 0x269   : > { %v469_v36 = vmax.f32 %v464_v34, 0.0 }
 0x26a   : > { %v466_v37 = vpop.f32.mrf.mxu0 }
 0x26b   : > { %v470_v38 = vpack.c.bf16 %v469_v36, %v469_v36 }
 0x26c   : > { %v644_v39 = vpop.f32.mrf.mxu0 }
 0x26d   : > { %648 = vmatmul.mubr.msk.bf16.vlgmr.msra.gmra.mxu1 %vm477_vm5, %v470_v38 }
 0x32d   : > { %v518_v41 = vpop.f32.mrf.mxu1 }
 0x32e   : > { %v519_v42 = vadd.f32 %v600_v40, %v518_v41 }
 0x32f   : > { %v649_v43 = vpop.f32.mrf.mxu1 }
 0x330   : > { %525 = vst.msk [vmem:[%s246_s10] sm:$0xff] %vm524_vm6, %v519_v42 }
 0x331   : > { %v521_v44 = vpop.f32.mrf.mxu1 }
 0x333   : > { %v650_v45 = vpop.f32.mrf.mxu1 }
 0x334 PF: > { %s16_s21 = sadd.s32 1, %s676_s21  }
 0x335   : > { %p13_p4 = scmp.ge.s32.totalorder %s16_s21, 5  }
 0x337   :  { %15 = sbr.rel (!%p13_p4) target bundleno = 1 (0x1), region = 74 }

</bundles_post_ra>
